<compile_context>
chip_gen: v7x
topology: tpu7x:2x2x1
jax: 0.10.0
libtpu: 0.0.40
codegen_flags: <defaults>
</compile_context>

<pallas_src>
import functools

import jax
import jax.numpy as jnp
from jax import lax
from jax.experimental import pallas as pl
from jax.experimental.pallas import tpu as pltpu

EPS = 1e-5


# ----------------------------- Pallas kernels -----------------------------

def _upconv_kernel(x_ref, w_ref, b_ref, o_ref):
    # x_ref: (R*W, Cin)        flattened row block of the pre-upsample input
    # w_ref: (Cin, 4*Cout)     all 2x2 taps fused, columns ordered (ki, kj, o)
    # b_ref: (1, 4*Cout)
    # o_ref: (R, 2, W, 2*Cout) layout (row, ki, col, (kj, o)); its row-major
    #                          reshape to (2R, 2W, Cout) NHWC is free in HBM.
    R, _, W, K2 = o_ref.shape
    y = jnp.dot(x_ref[...], w_ref[...],
                preferred_element_type=jnp.float32) + b_ref[...]
    o_ref[:, 0, :, :] = y[:, :K2].reshape(R, W, K2).astype(o_ref.dtype)
    o_ref[:, 1, :, :] = y[:, K2:].reshape(R, W, K2).astype(o_ref.dtype)


def _double_conv_kernel(xa_ref, xb_ref,
                        w1_ref, s1_ref, b1_ref,
                        w2_ref, s2_ref, b2_ref, o_ref, *, oh, ow):
    # xa_ref: (1, M, Ca)   x2 (first half of the channel concat), M = oh*ow
    # xb_ref: (1, M, Cb)   upsampled x1 (second half of the concat)
    # w1_ref: (9, Ca+Cb, Cmid)  first-conv taps, row-major (dy, dx)
    # w2_ref: (9, Cmid, Cout)
    # s*/b* : (1, C)            folded conv-bias + BatchNorm scale / bias
    # o_ref : (1, M, Cout)
    M = xa_ref.shape[1]

    # Channel concat done once in VMEM (lane concat) -> one matmul per tap.
    x = jnp.concatenate([xa_ref[0], xb_ref[0]], axis=-1)        # (M, Ca+Cb)

    # SAME-padding border masks, built ONCE and shared by both convs.
    flat = lax.broadcasted_iota(jnp.int32, (M, 1), 0)           # flat pixel id
    col = (flat & (ow - 1)) if (ow & (ow - 1)) == 0 else (flat % ow)
    row_m = [flat >= ow, None, flat < (oh - 1) * ow]            # dy = 0, 1, 2
    col_m = [col >= 1, None, col < (ow - 1)]                    # dx = 0, 1, 2
    tap_mask = []
    for dy in range(3):
        for dx in range(3):
            ms = [m for m in (row_m[dy], col_m[dx]) if m is not None]
            if not ms:
                tap_mask.append(None)
            elif len(ms) == 1:
                tap_mask.append(ms[0])
            else:
                tap_mask.append(jnp.logical_and(ms[0], ms[1]))

    def conv3x3(x, w_ref):
        cin, cout = x.shape[1], w_ref.shape[2]
        roll_input = cin < cout          # roll the narrower tensor (XLU bytes)
        acc = jnp.zeros((M, cout), jnp.float32)
        for dy in range(3):
            for dx in range(3):
                tap = dy * 3 + dx
                off = (dy - 1) * ow + (dx - 1)
                # out[g] += x[g + off] @ W_tap, zeroed where the 3x3 tap falls
                # outside the image.  pltpu.roll == np.roll: index i -> i+shift,
                # so rolled[g] = orig[g + off] needs shift = (-off) % M.
                shift = (-off) % M
                if roll_input:
                    xs = pltpu.roll(x, shift, axis=0) if shift else x
                    p = jnp.dot(xs, w_ref[tap],
                                preferred_element_type=jnp.float32)
                else:
                    p = jnp.dot(x, w_ref[tap],
                                preferred_element_type=jnp.float32)
                    if shift:
                        p = pltpu.roll(p, shift, axis=0)
                if tap_mask[tap] is not None:
                    p = jnp.where(tap_mask[tap], p, 0.0)
                acc = acc + p
        return acc

    h1 = jnp.maximum(conv3x3(x, w1_ref) * s1_ref[...] + b1_ref[...], 0.0)
    y = jnp.maximum(conv3x3(h1, w2_ref) * s2_ref[...] + b2_ref[...], 0.0)
    o_ref[0] = y.astype(o_ref.dtype)


# ------------------------------- helpers -----------------------------------

def _pick_row_block(rows_total, w, target):
    """Largest divisor of rows_total <= target keeping the (r*w) sublane dim
    a multiple of 8 (falls back to a single full block)."""
    target = max(1, min(rows_total, target))
    for r in range(target, 0, -1):
        if rows_total % r == 0 and (r * w) % 8 == 0:
            return r
    return rows_total


def _fold_bn(conv_b, gamma, beta, rmean, rvar):
    scale = gamma / jnp.sqrt(rvar + EPS)
    bias = beta + scale * (conv_b - rmean)
    return scale, bias


@functools.lru_cache(maxsize=None)
def _vmem_limit_bytes():
    # ~3/4 of physical VMEM (capped at 96 MiB): above the 16/32 MiB default
    # scoped limits on v5e/v6e, still safe on v7x's 64 MiB.
    try:
        cap = int(pltpu.get_tpu_info().vmem_capacity_bytes)
    except Exception:
        cap = 64 * 1024 * 1024
    return min((cap * 3) // 4, 96 * 1024 * 1024)


def _compiler_params(dims):
    return pltpu.CompilerParams(dimension_semantics=dims,
                                vmem_limit_bytes=_vmem_limit_bytes())


# ------------------------------ JAX wrappers -------------------------------

def conv_transpose2x2_stride2(x_nhwc, w, b):
    """ConvTranspose2d(kernel=2, stride=2). w: (Cin, Cout, 2, 2) torch layout."""
    N, H, W, Cin = x_nhwc.shape
    Cout = w.shape[1]
    # One fused weight slab; columns ordered (ki, kj, out_ch).
    w4 = jnp.transpose(w, (0, 2, 3, 1)).reshape(Cin, 4 * Cout)
    b4 = jnp.tile(b, 4)[None, :]

    x_flat = x_nhwc.reshape(N * H * W, Cin)          # free HBM reshape
    rows_total = N * H
    # Size the row block by a VMEM budget (~8 MiB of in+out per step, x2 for
    # double buffering); a single grid step if everything fits.
    per_row_bytes = 4 * W * (Cin + 4 * Cout)
    r_target = max(1, (8 * 1024 * 1024) // max(per_row_bytes, 1))
    R = _pick_row_block(rows_total, W, r_target)

    out = pl.pallas_call(
        _upconv_kernel,
        out_shape=jax.ShapeDtypeStruct((rows_total, 2, W, 2 * Cout), jnp.float32),
        grid=(rows_total // R,),
        in_specs=[
            pl.BlockSpec((R * W, Cin), lambda i: (i, 0)),
            pl.BlockSpec((Cin, 4 * Cout), lambda i: (0, 0)),
            pl.BlockSpec((1, 4 * Cout), lambda i: (0, 0)),
        ],
        out_specs=pl.BlockSpec((R, 2, W, 2 * Cout), lambda i: (i, 0, 0, 0)),
        compiler_params=_compiler_params(("parallel",)),
    )(x_flat, w4, b4)

    # (N*H, 2, W, 2*Cout) -> (N, 2H, 2W, Cout) is a pure row-major reshape
    # (the HBM store already performed the 2x2 interleave).
    return out.reshape(N, 2 * H, 2 * W, Cout)


def double_conv_fused(xa, xb, oh, ow, p):
    """Fused concat([xa, xb], C) -> conv3x3+BN+ReLU -> conv3x3+BN+ReLU."""
    N, M, Ca = xa.shape
    Cb = xb.shape[2]
    Cmid = p["c1_w"].shape[0]
    Cout = p["c2_w"].shape[0]

    w1 = jnp.transpose(p["c1_w"], (2, 3, 1, 0)).reshape(9, Ca + Cb, Cmid)
    w2 = jnp.transpose(p["c2_w"], (2, 3, 1, 0)).reshape(9, Cmid, Cout)
    s1, b1 = _fold_bn(p["c1_b"], p["bn1_g"], p["bn1_b"], p["bn1_m"], p["bn1_v"])
    s2, b2 = _fold_bn(p["c2_b"], p["bn2_g"], p["bn2_b"], p["bn2_m"], p["bn2_v"])

    kernel = functools.partial(_double_conv_kernel, oh=oh, ow=ow)
    out = pl.pallas_call(
        kernel,
        out_shape=jax.ShapeDtypeStruct((N, M, Cout), jnp.float32),
        grid=(N,),
        in_specs=[
            pl.BlockSpec((1, M, Ca), lambda n: (n, 0, 0)),
            pl.BlockSpec((1, M, Cb), lambda n: (n, 0, 0)),
            pl.BlockSpec((9, Ca + Cb, Cmid), lambda n: (0, 0, 0)),
            pl.BlockSpec((1, Cmid), lambda n: (0, 0)),
            pl.BlockSpec((1, Cmid), lambda n: (0, 0)),
            pl.BlockSpec((9, Cmid, Cout), lambda n: (0, 0, 0)),
            pl.BlockSpec((1, Cout), lambda n: (0, 0)),
            pl.BlockSpec((1, Cout), lambda n: (0, 0)),
        ],
        out_specs=pl.BlockSpec((1, M, Cout), lambda n: (n, 0, 0)),
        compiler_params=_compiler_params(("parallel",)),
    )(xa, xb, w1, s1[None, :], b1[None, :], w2, s2[None, :], b2[None, :])
    return out


def up_convolution_forward(x1_nchw, x2_nchw, p):
    """Matches UpConvolution.forward(x1, x2): up(x1), cat([x2, x1], C), DoubleConv."""
    x1 = jnp.transpose(x1_nchw, (0, 2, 3, 1))   # NCHW -> NHWC
    x2 = jnp.transpose(x2_nchw, (0, 2, 3, 1))
    N, H1, W1, _ = x1.shape
    oh, ow = 2 * H1, 2 * W1
    Cout = p["c2_w"].shape[0]

    x1u = conv_transpose2x2_stride2(x1, p["up_w"], p["up_b"])  # (N, oh, ow, C)
    xa = x2.reshape(N, oh * ow, x2.shape[-1])   # free reshapes; no HBM concat
    xb = x1u.reshape(N, oh * ow, x1u.shape[-1])

    y = double_conv_fused(xa, xb, oh, ow, p)    # (N, oh*ow, Cout)
    y = y.reshape(N, oh, ow, Cout)
    return jnp.transpose(y, (0, 3, 1, 2))       # NHWC -> NCHW


# ---------------------------- pure-JAX reference ---------------------------

def _ref_forward(x1_nchw, x2_nchw, p):
    x1 = jnp.transpose(x1_nchw, (0, 2, 3, 1))
    x2 = jnp.transpose(x2_nchw, (0, 2, 3, 1))
    N, H, W, C = x1.shape
    Cout_up = p["up_w"].shape[1]
    up = jnp.einsum("nijc,cokl->nikjlo", x1, p["up_w"])
    up = up.reshape(N, 2 * H, 2 * W, Cout_up) + p["up_b"]
    x = jnp.concatenate([x2, up], axis=-1)

    def cbr(x, w, cb, g, b, m, v):
        y = jax.lax.conv_general_dilated(
            x, w, window_strides=(1, 1), padding="SAME",
            dimension_numbers=("NHWC", "OIHW", "NHWC"))
        s = g / jnp.sqrt(v + EPS)
        return jnp.maximum(y * s + (b + s * (cb - m)), 0.0)

    x = cbr(x, p["c1_w"], p["c1_b"], p["bn1_g"], p["bn1_b"], p["bn1_m"], p["bn1_v"])
    x = cbr(x, p["c2_w"], p["c2_b"], p["bn2_g"], p["bn2_b"], p["bn2_m"], p["bn2_v"])
    return jnp.transpose(x, (0, 3, 1, 2))


# ---------------------------------- main -----------------------------------

if __name__ == "__main__":
    N, in_ch, out_ch, H1, W1 = 2, 8, 8, 16, 16   # x1 spatial 16 -> upsampled 32
    c_half = in_ch // 2

    key = jax.random.PRNGKey(0)
    keys = jax.random.split(key, 16)

    params = {
        # ConvTranspose2d(in_ch//2, in_ch//2, 2, stride=2): weight (Cin, Cout, 2, 2)
        "up_w": 0.1 * jax.random.normal(keys[0], (c_half, c_half, 2, 2), jnp.float32),
        "up_b": 0.1 * jax.random.normal(keys[1], (c_half,), jnp.float32),
        # Conv2d(in_ch, out_ch, 3, padding=1) + BatchNorm2d(out_ch) (eval stats)
        "c1_w": 0.1 * jax.random.normal(keys[2], (out_ch, in_ch, 3, 3), jnp.float32),
        "c1_b": 0.1 * jax.random.normal(keys[3], (out_ch,), jnp.float32),
        "bn1_g": 1.0 + 0.1 * jax.random.normal(keys[8], (out_ch,), jnp.float32),
        "bn1_b": 0.1 * jax.random.normal(keys[9], (out_ch,), jnp.float32),
        "bn1_m": 0.1 * jax.random.normal(keys[10], (out_ch,), jnp.float32),
        "bn1_v": 1.0 + 0.1 * jnp.abs(jax.random.normal(keys[11], (out_ch,), jnp.float32)),
        # Conv2d(out_ch, out_ch, 3, padding=1) + BatchNorm2d(out_ch)
        "c2_w": 0.1 * jax.random.normal(keys[4], (out_ch, out_ch, 3, 3), jnp.float32),
        "c2_b": 0.1 * jax.random.normal(keys[5], (out_ch,), jnp.float32),
        "bn2_g": 1.0 + 0.1 * jax.random.normal(keys[12], (out_ch,), jnp.float32),
        "bn2_b": 0.1 * jax.random.normal(keys[13], (out_ch,), jnp.float32),
        "bn2_m": 0.1 * jax.random.normal(keys[14], (out_ch,), jnp.float32),
        "bn2_v": 1.0 + 0.1 * jnp.abs(jax.random.normal(keys[15], (out_ch,), jnp.float32)),
    }

    x1 = jax.random.normal(keys[6], (N, c_half, H1, W1), jnp.float32)
    x2 = jax.random.normal(keys[7], (N, c_half, 2 * H1, 2 * W1), jnp.float32)

    out = jax.block_until_ready(up_convolution_forward(x1, x2, params))
    assert out.shape == (N, out_ch, 2 * H1, 2 * W1), out.shape

    ref = jax.block_until_ready(_ref_forward(x1, x2, params))
    if not jnp.allclose(out, ref, atol=5e-3, rtol=5e-3):
        raise AssertionError(
            f"mismatch vs reference: max abs err = {jnp.max(jnp.abs(out - ref))}")

    print("KERNEL_OK")
</pallas_src>

<mosaic_0001>
module attributes {stable_mosaic.version = 11 : i64} {
  func.func @_upconv_kernel(%arg0: i32, %arg1: memref<512x4xf32, #tpu.memory_space<vmem>>, %arg2: memref<4x16xf32, #tpu.memory_space<vmem>>, %arg3: memref<1x16xf32, #tpu.memory_space<vmem>>, %arg4: memref<32x2x16x8xf32, #tpu.memory_space<vmem>>) attributes {dimension_semantics = [#tpu.dimension_semantics<parallel>], iteration_bounds = array<i64: 1>, scalar_prefetch = 0 : i64, scratch_operands = 0 : i64, tpu.core_type = #tpu.core_type<tc>, window_params = [{transform_indices = @transform_0, window_bounds = array<i64: 512, 4>}, {pipeline_mode = #tpu.pipeline_mode<synchronous>, transform_indices = @transform_1, window_bounds = array<i64: 4, 16>}, {pipeline_mode = #tpu.pipeline_mode<synchronous>, transform_indices = @transform_2, window_bounds = array<i64: 1, 16>}, {transform_indices = @transform_3, window_bounds = array<i64: 32, 2, 16, 8>}]} {
    %c0 = arith.constant 0 : index
    %c0_0 = arith.constant 0 : index
    %0 = vector.load %arg1[%c0, %c0_0] : memref<512x4xf32, #tpu.memory_space<vmem>>, vector<512x4xf32>
    %c0_1 = arith.constant 0 : index
    %c0_2 = arith.constant 0 : index
    %1 = vector.load %arg2[%c0_1, %c0_2] : memref<4x16xf32, #tpu.memory_space<vmem>>, vector<4x16xf32>
    %cst = arith.constant dense<0.000000e+00> : vector<512x16xf32>
    %2 = tpu.matmul %0, %1, %cst {dimension_numbers = #tpu.dot_dimension_numbers<[1], [0], [0], [1], [0, 0, 1, 1], [], []>} : vector<512x4xf32>, vector<4x16xf32>, vector<512x16xf32> -> vector<512x16xf32>
    %c0_3 = arith.constant 0 : index
    %c0_4 = arith.constant 0 : index
    %3 = vector.load %arg3[%c0_3, %c0_4] : memref<1x16xf32, #tpu.memory_space<vmem>>, vector<1x16xf32>
    %4 = vector.broadcast %3 : vector<1x16xf32> to vector<512x16xf32>
    %5 = arith.addf %2, %4 : vector<512x16xf32>
    %6 = vector.extract_strided_slice %5 {offsets = [0, 0], sizes = [512, 8], strides = [1, 1]} : vector<512x16xf32> to vector<512x8xf32>
    %7 = vector.shape_cast %6 : vector<512x8xf32> to vector<32x16x8xf32>
    %c0_5 = arith.constant 0 : index
    %c0_6 = arith.constant 0 : index
    %c0_7 = arith.constant 0 : index
    %c0_8 = arith.constant 0 : index
    %8 = vector.load %arg4[%c0_5, %c0_6, %c0_7, %c0_8] : memref<32x2x16x8xf32, #tpu.memory_space<vmem>>, vector<32x1x16x8xf32>
    %9 = vector.shape_cast %8 : vector<32x1x16x8xf32> to vector<32x16x8xf32>
    %10 = vector.shape_cast %7 : vector<32x16x8xf32> to vector<32x1x16x8xf32>
    tpu.vector_store %arg4[%c0_5, %c0_6, %c0_7, %c0_8], %10 {strides = array<i32>} : memref<32x2x16x8xf32, #tpu.memory_space<vmem>>, vector<32x1x16x8xf32>,
    %11 = vector.extract_strided_slice %5 {offsets = [0, 8], sizes = [512, 8], strides = [1, 1]} : vector<512x16xf32> to vector<512x8xf32>
    %12 = vector.shape_cast %11 : vector<512x8xf32> to vector<32x16x8xf32>
    %c0_9 = arith.constant 0 : index
    %c1 = arith.constant 1 : index
    %c0_10 = arith.constant 0 : index
    %c0_11 = arith.constant 0 : index
    %13 = vector.load %arg4[%c0_9, %c1, %c0_10, %c0_11] : memref<32x2x16x8xf32, #tpu.memory_space<vmem>>, vector<32x1x16x8xf32>
    %14 = vector.shape_cast %13 : vector<32x1x16x8xf32> to vector<32x16x8xf32>
    %15 = vector.shape_cast %12 : vector<32x16x8xf32> to vector<32x1x16x8xf32>
    tpu.vector_store %arg4[%c0_9, %c1, %c0_10, %c0_11], %15 {strides = array<i32>} : memref<32x2x16x8xf32, #tpu.memory_space<vmem>>, vector<32x1x16x8xf32>,
    return
  }
  func.func @transform_0(%arg0: i32) -> (i32, i32) {
    %c0_i32 = arith.constant 0 : i32
    %c0_i32_0 = arith.constant 0 : i32
    return %arg0, %c0_i32 : i32, i32
  }
  func.func @transform_1(%arg0: i32) -> (i32, i32) {
    %c0_i32 = arith.constant 0 : i32
    %c0_i32_0 = arith.constant 0 : i32
    %c0_i32_1 = arith.constant 0 : i32
    return %c0_i32, %c0_i32_0 : i32, i32
  }
  func.func @transform_2(%arg0: i32) -> (i32, i32) {
    %c0_i32 = arith.constant 0 : i32
    %c0_i32_0 = arith.constant 0 : i32
    %c0_i32_1 = arith.constant 0 : i32
    return %c0_i32, %c0_i32_0 : i32, i32
  }
  func.func @transform_3(%arg0: i32) -> (i32, i32, i32, i32) {
    %c0_i32 = arith.constant 0 : i32
    %c0_i32_0 = arith.constant 0 : i32
    %c0_i32_1 = arith.constant 0 : i32
    %c0_i32_2 = arith.constant 0 : i32
    return %arg0, %c0_i32, %c0_i32_0, %c0_i32_1 : i32, i32, i32, i32
  }
}

</mosaic_0001>

<bundles_post_ra>
// kernel: tpu_custom_call.1
= control target key start
LH: loop header
LB: loop body
LE: loop exit
PB: predicated region body
PF: predicated region fallthrough
CT: control target
= control target key end

     0   :  { %vm279_vm0 = vcmask 1043456   ;;  %vm86_vm1 = vcmask 31744   ;;  %vm668_vm2 = vcmask 64512   ;;  %s1354_s6 = smov 120   ;;  %s2415_s1 = inlined_call_operand.vmem [shape: f32[4,16], index: 1, kind: input, shape index: {}]   ;;  %s2416_s0 = inlined_call_operand.vmem [shape: f32[512,4], index: 0, kind: input, shape index: {}]   ;;  %s2417_s2 = inlined_call_operand.vmem [shape: f32[1,16], index: 2, kind: input, shape index: {}]   ;;  %s2418_s3 = inlined_call_operand.vmem [shape: f32[32,2,16,8], index: 3, kind: output, shape index: {}]  }
   0x1   :  { %v78_v0 = vld [vmem:[%s2415_s1] sm:$0xf]  ;;  %v15_v3 = vld [vmem:[%s2416_s0 + $0x8] sm:$0xff]  ;;  %v16_v5 = vld [vmem:[%s2416_s0 + $0x10] sm:$0xff] }
   0x2   :  { %v14_v1 = vld [vmem:[%s2416_s0] sm:$0xff]  ;;  %1253 = vmatprep.subr.msk.mxu0 %vm279_vm0, %v78_v0  ;;  %1351 = vmatprep.subr.msk.mxu1 %vm279_vm0, %v78_v0  ;;  %v47_v4 = vld [vmem:[%s2416_s0 + $0x108] sm:$0xff]  ;;  %v48_v6 = vld [vmem:[%s2416_s0 + $0x110] sm:$0xff] }
   0x3   :  { %v46_v2 = vld [vmem:[%s2416_s0 + $0x100] sm:$0xff]  ;;  %1254 = vmatpush3.msk.msra.mxu0 %vm279_vm0, %v78_v0  ;;  %1352 = vmatpush3.msk.msra.mxu1 %vm279_vm0, %v78_v0  ;;  %v17_v7 = vld [vmem:[%s2416_s0 + $0x18] sm:$0xff]  ;;  %v19_v11 = vld [vmem:[%s2416_s0 + $0x28] sm:$0xff] }
   0x4   :  { %1255 = vmatprep.mubr.msk.f32.mxu0 %vm86_vm1, %v14_v1  ;;  %1303 = vmatprep.mubr.msk.f32.mxu1 %vm86_vm1, %v46_v2  ;;  %v49_v8 = vld [vmem:[%s2416_s0 + $0x118] sm:$0xff]  ;;  %v18_v9 = vld [vmem:[%s2416_s0 + $0x20] sm:$0xff]  ;;  %v51_v12 = vld [vmem:[%s2416_s0 + $0x128] sm:$0xff] }
   0x5   :  { %1256 = vmatmul.mubr.msk.f32.vlgmr.msra.gmra.mrb[0].mxu0 %vm86_vm1, %v15_v3  ;;  %1304 = vmatmul.mubr.msk.f32.vlgmr.msra.gmra.mrb[0].mxu1 %vm86_vm1, %v47_v4  ;;  %v50_v10 = vld [vmem:[%s2416_s0 + $0x120] sm:$0xff]  ;;  %v20_v13 = vld [vmem:[%s2416_s0 + $0x30] sm:$0xff]  ;;  %v21_v15 = vld [vmem:[%s2416_s0 + $0x38] sm:$0xff] }
   0x6   :  { %1258 = vmatprep.mubr.msk.f32.mxu0 %vm86_vm1, %v16_v5  ;;  %1306 = vmatprep.mubr.msk.f32.mxu1 %vm86_vm1, %v48_v6  ;;  %v52_v14 = vld [vmem:[%s2416_s0 + $0x130] sm:$0xff]  ;;  %v53_v16 = vld [vmem:[%s2416_s0 + $0x138] sm:$0xff]  ;;  %v22_v17 = vld [vmem:[%s2416_s0 + $0x40] sm:$0xff] }
   0x7   :  { %v54_v18 = vld [vmem:[%s2416_s0 + $0x140] sm:$0xff]  ;;  %v23_v19 = vld [vmem:[%s2416_s0 + $0x48] sm:$0xff]  ;;  %v24_v21 = vld [vmem:[%s2416_s0 + $0x50] sm:$0xff] }
   0x8   :  { %v55_v20 = vld [vmem:[%s2416_s0 + $0x148] sm:$0xff]  ;;  %v56_v22 = vld [vmem:[%s2416_s0 + $0x150] sm:$0xff]  ;;  %v25_v23 = vld [vmem:[%s2416_s0 + $0x58] sm:$0xff] }
   0x9   :  { %1259 = vmatmul.mubr.msk.f32.gmra.mrb[2].mxu0 %vm86_vm1, %v17_v7  ;;  %1307 = vmatmul.mubr.msk.f32.gmra.mrb[2].mxu1 %vm86_vm1, %v49_v8  ;;  %v57_v24 = vld [vmem:[%s2416_s0 + $0x158] sm:$0xff]  ;;  %v26_v25 = vld [vmem:[%s2416_s0 + $0x60] sm:$0xff]  ;;  %v27_v27 = vld [vmem:[%s2416_s0 + $0x68] sm:$0xff] }
   0xa   :  { %1261 = vmatprep.mubr.msk.f32.mxu0 %vm86_vm1, %v18_v9  ;;  %1309 = vmatprep.mubr.msk.f32.mxu1 %vm86_vm1, %v50_v10  ;;  %v58_v26 = vld [vmem:[%s2416_s0 + $0x160] sm:$0xff]  ;;  %v59_v28 = vld [vmem:[%s2416_s0 + $0x168] sm:$0xff]  ;;  %v28_v29 = vld [vmem:[%s2416_s0 + $0x70] sm:$0xff] }
   0xb   :  { %v60_v30 = vld [vmem:[%s2416_s0 + $0x170] sm:$0xff]  ;;  %v29_v31 = vld [vmem:[%s2416_s0 + $0x78] sm:$0xff]  ;;  %v30_v33 = vld [vmem:[%s2416_s0 + $0x80] sm:$0xff] }
   0xc   :  { %v61_v32 = vld [vmem:[%s2416_s0 + $0x178] sm:$0xff]  ;;  %v62_v34 = vld [vmem:[%s2416_s0 + $0x180] sm:$0xff]  ;;  %v31_v35 = vld [vmem:[%s2416_s0 + $0x88] sm:$0xff] }
   0xd   :  { %1262 = vmatmul.mubr.msk.f32.gmra.mrb[4].mxu0 %vm86_vm1, %v19_v11  ;;  %1310 = vmatmul.mubr.msk.f32.gmra.mrb[4].mxu1 %vm86_vm1, %v51_v12  ;;  %v63_v36 = vld [vmem:[%s2416_s0 + $0x188] sm:$0xff]  ;;  %v32_v37 = vld [vmem:[%s2416_s0 + $0x90] sm:$0xff]  ;;  %v33_v39 = vld [vmem:[%s2416_s0 + $0x98] sm:$0xff] }
   0xe   :  { %1264 = vmatprep.mubr.msk.f32.mxu0 %vm86_vm1, %v20_v13  ;;  %1312 = vmatprep.mubr.msk.f32.mxu1 %vm86_vm1, %v52_v14  ;;  %v64_v38 = vld [vmem:[%s2416_s0 + $0x190] sm:$0xff]  ;;  %v65_v40 = vld [vmem:[%s2416_s0 + $0x198] sm:$0xff]  ;;  %v34_v41 = vld [vmem:[%s2416_s0 + $0xa0] sm:$0xff] }
   0xf   :  { %v66_v42 = vld [vmem:[%s2416_s0 + $0x1a0] sm:$0xff]  ;;  %v35_v43 = vld [vmem:[%s2416_s0 + $0xa8] sm:$0xff]  ;;  %v36_v45 = vld [vmem:[%s2416_s0 + $0xb0] sm:$0xff] }
  0x10   :  { %v67_v44 = vld [vmem:[%s2416_s0 + $0x1a8] sm:$0xff]  ;;  %v68_v46 = vld [vmem:[%s2416_s0 + $0x1b0] sm:$0xff]  ;;  %v37_v47 = vld [vmem:[%s2416_s0 + $0xb8] sm:$0xff] }
  0x11   :  { %1265 = vmatmul.mubr.msk.f32.gmra.mrb[6].mxu0 %vm86_vm1, %v21_v15  ;;  %1313 = vmatmul.mubr.msk.f32.gmra.mrb[6].mxu1 %vm86_vm1, %v53_v16  ;;  %v69_v48 = vld [vmem:[%s2416_s0 + $0x1b8] sm:$0xff]  ;;  %v38_v49 = vld [vmem:[%s2416_s0 + $0xc0] sm:$0xff]  ;;  %v39_v51 = vld [vmem:[%s2416_s0 + $0xc8] sm:$0xff] }
  0x12   :  { %1267 = vmatprep.mubr.msk.f32.mxu0 %vm86_vm1, %v22_v17  ;;  %1315 = vmatprep.mubr.msk.f32.mxu1 %vm86_vm1, %v54_v18  ;;  %v70_v50 = vld [vmem:[%s2416_s0 + $0x1c0] sm:$0xff]  ;;  %v71_v52 = vld [vmem:[%s2416_s0 + $0x1c8] sm:$0xff]  ;;  %v40_v53 = vld [vmem:[%s2416_s0 + $0xd0] sm:$0xff] }
  0x13   :  { %v72_v54 = vld [vmem:[%s2416_s0 + $0x1d0] sm:$0xff]  ;;  %v41_v55 = vld [vmem:[%s2416_s0 + $0xd8] sm:$0xff]  ;;  %v42_v57 = vld [vmem:[%s2416_s0 + $0xe0] sm:$0xff] }
  0x14   :  { %v73_v56 = vld [vmem:[%s2416_s0 + $0x1d8] sm:$0xff]  ;;  %v74_v58 = vld [vmem:[%s2416_s0 + $0x1e0] sm:$0xff]  ;;  %v43_v59 = vld [vmem:[%s2416_s0 + $0xe8] sm:$0xff] }
  0x15   :  { %1268 = vmatmul.mubr.msk.f32.gmra.mrb[8].mxu0 %vm86_vm1, %v23_v19  ;;  %1316 = vmatmul.mubr.msk.f32.gmra.mrb[8].mxu1 %vm86_vm1, %v55_v20  ;;  %v75_v60 = vld [vmem:[%s2416_s0 + $0x1e8] sm:$0xff]  ;;  %v44_v61 = vld [vmem:[%s2416_s0 + $0xf0] sm:$0xff]  ;;  %v45_v63 = vld [vmem:[%s2416_s0 + $0xf8] sm:$0xff] }
  0x16   :  { %1270 = vmatprep.mubr.msk.f32.mxu0 %vm86_vm1, %v24_v21  ;;  %1318 = vmatprep.mubr.msk.f32.mxu1 %vm86_vm1, %v56_v22  ;;  %v76_v62 = vld [vmem:[%s2416_s0 + $0x1f0] sm:$0xff]  ;;  %v77_v0 = vld [vmem:[%s2416_s0 + $0x1f8] sm:$0xff]  ;;  %v1637_v1 = vld [vmem:[%s2417_s2] ss:$0 sm:$0xff] }
  0x19   :  { %1271 = vmatmul.mubr.msk.f32.gmra.mrb[10].mxu0 %vm86_vm1, %v25_v23  ;;  %1319 = vmatmul.mubr.msk.f32.gmra.mrb[10].mxu1 %vm86_vm1, %v57_v24 }
  0x1a   :  { %1273 = vmatprep.mubr.msk.f32.mxu0 %vm86_vm1, %v26_v25  ;;  %1321 = vmatprep.mubr.msk.f32.mxu1 %vm86_vm1, %v58_v26 }
  0x1d   :  { %1274 = vmatmul.mubr.msk.f32.gmra.mrb[12].mxu0 %vm86_vm1, %v27_v27  ;;  %1322 = vmatmul.mubr.msk.f32.gmra.mrb[12].mxu1 %vm86_vm1, %v59_v28 }
  0x1e   :  { %1276 = vmatprep.mubr.msk.f32.mxu0 %vm86_vm1, %v28_v29  ;;  %1324 = vmatprep.mubr.msk.f32.mxu1 %vm86_vm1, %v60_v30 }
  0x21   :  { %1277 = vmatmul.mubr.msk.f32.gmra.mrb[14].mxu0 %vm86_vm1, %v29_v31  ;;  %1325 = vmatmul.mubr.msk.f32.gmra.mrb[14].mxu1 %vm86_vm1, %v61_v32 }
  0x22   :  { %1279 = vmatprep.mubr.msk.f32.mxu0 %vm86_vm1, %v30_v33  ;;  %1327 = vmatprep.mubr.msk.f32.mxu1 %vm86_vm1, %v62_v34 }
  0x25   :  { %1280 = vmatmul.mubr.msk.f32.gmra.mrb[16].mxu0 %vm86_vm1, %v31_v35  ;;  %1328 = vmatmul.mubr.msk.f32.gmra.mrb[16].mxu1 %vm86_vm1, %v63_v36 }
  0x26   :  { %1282 = vmatprep.mubr.msk.f32.mxu0 %vm86_vm1, %v32_v37  ;;  %1330 = vmatprep.mubr.msk.f32.mxu1 %vm86_vm1, %v64_v38 }
  0x29   :  { %1283 = vmatmul.mubr.msk.f32.gmra.mrb[18].mxu0 %vm86_vm1, %v33_v39  ;;  %1331 = vmatmul.mubr.msk.f32.gmra.mrb[18].mxu1 %vm86_vm1, %v65_v40 }
  0x2a   :  { %1285 = vmatprep.mubr.msk.f32.mxu0 %vm86_vm1, %v34_v41  ;;  %1333 = vmatprep.mubr.msk.f32.mxu1 %vm86_vm1, %v66_v42 }
  0x2d   :  { %1286 = vmatmul.mubr.msk.f32.gmra.mrb[20].mxu0 %vm86_vm1, %v35_v43  ;;  %1334 = vmatmul.mubr.msk.f32.gmra.mrb[20].mxu1 %vm86_vm1, %v67_v44 }
  0x2e   :  { %1288 = vmatprep.mubr.msk.f32.mxu0 %vm86_vm1, %v36_v45  ;;  %1336 = vmatprep.mubr.msk.f32.mxu1 %vm86_vm1, %v68_v46 }
  0x31   :  { %1289 = vmatmul.mubr.msk.f32.gmra.mrb[22].mxu0 %vm86_vm1, %v37_v47  ;;  %1337 = vmatmul.mubr.msk.f32.gmra.mrb[22].mxu1 %vm86_vm1, %v69_v48 }
  0x32   :  { %1291 = vmatprep.mubr.msk.f32.mxu0 %vm86_vm1, %v38_v49  ;;  %1339 = vmatprep.mubr.msk.f32.mxu1 %vm86_vm1, %v70_v50 }
  0x35   :  { %1292 = vmatmul.mubr.msk.f32.gmra.mrb[24].mxu0 %vm86_vm1, %v39_v51  ;;  %1340 = vmatmul.mubr.msk.f32.gmra.mrb[24].mxu1 %vm86_vm1, %v71_v52 }
  0x36   :  { %1294 = vmatprep.mubr.msk.f32.mxu0 %vm86_vm1, %v40_v53  ;;  %1342 = vmatprep.mubr.msk.f32.mxu1 %vm86_vm1, %v72_v54 }
  0x39   :  { %1295 = vmatmul.mubr.msk.f32.gmra.mrb[26].mxu0 %vm86_vm1, %v41_v55  ;;  %1343 = vmatmul.mubr.msk.f32.gmra.mrb[26].mxu1 %vm86_vm1, %v73_v56 }
  0x3a   :  { %1297 = vmatprep.mubr.msk.f32.mxu0 %vm86_vm1, %v42_v57  ;;  %1345 = vmatprep.mubr.msk.f32.mxu1 %vm86_vm1, %v74_v58 }
  0x3d   :  { %1298 = vmatmul.mubr.msk.f32.gmra.mrb[28].mxu0 %vm86_vm1, %v43_v59  ;;  %1346 = vmatmul.mubr.msk.f32.gmra.mrb[28].mxu1 %vm86_vm1, %v75_v60 }
  0x3e   :  { %1300 = vmatprep.mubr.msk.f32.mxu0 %vm86_vm1, %v44_v61  ;;  %1348 = vmatprep.mubr.msk.f32.mxu1 %vm86_vm1, %v76_v62 }
  0x41   :  { %1301 = vmatmul.mubr.msk.f32.gmra.mrb[30].mxu0 %vm86_vm1, %v45_v63  ;;  %1349 = vmatmul.mubr.msk.f32.gmra.mrb[30].mxu1 %vm86_vm1, %v77_v0 }
  0xd8   :  { %v1257_v2 = vpop.f32.mrb[0].mxu0  ;;  %v1305_v3 = vpop.f32.mrb[0].mxu1 }
  0xd9   :  { %v355_v4 = vadd.f32 %v1257_v2, %v1637_v1  ;;  %v515_v5 = vadd.f32 %v1305_v3, %v1637_v1  ;;  %v349_v6 = vpop.f32.mrb[1].mxu0  ;;  %v509_v7 = vpop.f32.mrb[1].mxu1 }
  0xda   :  { %v350_v8 = vadd.f32 %v1637_v1, %v349_v6  ;;  %v510_v9 = vadd.f32 %v1637_v1, %v509_v7 }
  0xdb   :  { %670 = vst.msk [vmem:[%s2418_s3 + $0x8] sm:$0xff] %vm668_vm2, %v355_v4  ;;  %702 = vst.msk [vmem:[%s2418_s3 + $0x208] sm:$0xff] %vm668_vm2, %v515_v5  ;;  %863 = vrot.lane.b32.xlu1 %v515_v5, %s1354_s6  ;;  %799 = vrot.lane.b32.xlu0 %v355_v4, %s1354_s6 }
  0xdc   :  { %669 = vst.msk [vmem:[%s2418_s3] sm:$0xff] %vm668_vm2, %v350_v8  ;;  %701 = vst.msk [vmem:[%s2418_s3 + $0x200] sm:$0xff] %vm668_vm2, %v510_v9  ;;  %v1260_v10 = vpop.f32.mrb[2].mxu0  ;;  %v1308_v11 = vpop.f32.mrb[2].mxu1 }
  0xdd   :  { %v365_v12 = vadd.f32 %v1260_v10, %v1637_v1  ;;  %v359_v13 = vpop.f32.mrb[3].mxu0  ;;  %v525_v14 = vadd.f32 %v1308_v11, %v1637_v1  ;;  %v519_v15 = vpop.f32.mrb[3].mxu1 }
  0xde   :  { %v360_v16 = vadd.f32 %v1637_v1, %v359_v13  ;;  %v520_v17 = vadd.f32 %v1637_v1, %v519_v15 }
  0xdf   :  { %672 = vst.msk [vmem:[%s2418_s3 + $0x28] sm:$0xff] %vm668_vm2, %v365_v12  ;;  %704 = vst.msk [vmem:[%s2418_s3 + $0x228] sm:$0xff] %vm668_vm2, %v525_v14  ;;  %803 = vrot.lane.b32.xlu1 %v365_v12, %s1354_s6  ;;  %797 = vrot.lane.b32.xlu0 %v350_v8, %s1354_s6 }
  0xe0   :  { %671 = vst.msk [vmem:[%s2418_s3 + $0x20] sm:$0xff] %vm668_vm2, %v360_v16  ;;  %703 = vst.msk [vmem:[%s2418_s3 + $0x220] sm:$0xff] %vm668_vm2, %v520_v17  ;;  %v1263_v18 = vpop.f32.mrb[4].mxu0  ;;  %v1311_v19 = vpop.f32.mrb[4].mxu1 }
  0xe1   :  { %v375_v20 = vadd.f32 %v1263_v18, %v1637_v1  ;;  %v369_v21 = vpop.f32.mrb[5].mxu0  ;;  %v535_v22 = vadd.f32 %v1311_v19, %v1637_v1  ;;  %v529_v23 = vpop.f32.mrb[5].mxu1 }
  0xe2   :  { %v370_v24 = vadd.f32 %v1637_v1, %v369_v21  ;;  %v530_v25 = vadd.f32 %v1637_v1, %v529_v23 }
  0xe3   :  { %867 = vrot.lane.b32.xlu1 %v525_v14, %s1354_s6  ;;  %861 = vrot.lane.b32.xlu0 %v510_v9, %s1354_s6  ;;  %674 = vst.msk [vmem:[%s2418_s3 + $0x48] sm:$0xff] %vm668_vm2, %v375_v20  ;;  %706 = vst.msk [vmem:[%s2418_s3 + $0x248] sm:$0xff] %vm668_vm2, %v535_v22 }
  0xe4   :  { %673 = vst.msk [vmem:[%s2418_s3 + $0x40] sm:$0xff] %vm668_vm2, %v370_v24  ;;  %705 = vst.msk [vmem:[%s2418_s3 + $0x240] sm:$0xff] %vm668_vm2, %v530_v25  ;;  %v1266_v26 = vpop.f32.mrb[6].mxu0  ;;  %v1314_v27 = vpop.f32.mrb[6].mxu1 }
  0xe5   :  { %v385_v28 = vadd.f32 %v1266_v26, %v1637_v1  ;;  %v379_v29 = vpop.f32.mrb[7].mxu0  ;;  %v545_v30 = vadd.f32 %v1314_v27, %v1637_v1  ;;  %v539_v31 = vpop.f32.mrb[7].mxu1 }
  0xe6   :  { %v380_v32 = vadd.f32 %v1637_v1, %v379_v29  ;;  %v540_v33 = vadd.f32 %v1637_v1, %v539_v31 }
  0xe7   :  { %801 = vrot.lane.b32.xlu1 %v360_v16, %s1354_s6  ;;  %865 = vrot.lane.b32.xlu0 %v520_v17, %s1354_s6  ;;  %676 = vst.msk [vmem:[%s2418_s3 + $0x68] sm:$0xff] %vm668_vm2, %v385_v28  ;;  %708 = vst.msk [vmem:[%s2418_s3 + $0x268] sm:$0xff] %vm668_vm2, %v545_v30 }
  0xe8   :  { %675 = vst.msk [vmem:[%s2418_s3 + $0x60] sm:$0xff] %vm668_vm2, %v380_v32  ;;  %707 = vst.msk [vmem:[%s2418_s3 + $0x260] sm:$0xff] %vm668_vm2, %v540_v33  ;;  %v1269_v34 = vpop.f32.mrb[8].mxu0  ;;  %v1317_v35 = vpop.f32.mrb[8].mxu1 }
  0xe9   :  { %v395_v36 = vadd.f32 %v1269_v34, %v1637_v1  ;;  %v389_v37 = vpop.f32.mrb[9].mxu0  ;;  %v1729_v38 = vadd.f32 %v1317_v35, %v1637_v1  ;;  %v549_v39 = vpop.f32.mrb[9].mxu1 }
  0xea   :  { %v390_v40 = vadd.f32 %v1637_v1, %v389_v37  ;;  %v1733_v41 = vadd.f32 %v1637_v1, %v549_v39 }
  0xeb   :  { %807 = vrot.lane.b32.xlu1 %v375_v20, %s1354_s6  ;;  %805 = vrot.lane.b32.xlu0 %v370_v24, %s1354_s6  ;;  %678 = vst.msk [vmem:[%s2418_s3 + $0x88] sm:$0xff] %vm668_vm2, %v395_v36  ;;  %710 = vst.msk [vmem:[%s2418_s3 + $0x288] sm:$0xff] %vm668_vm2, %v1729_v38 }
  0xec   :  { %677 = vst.msk [vmem:[%s2418_s3 + $0x80] sm:$0xff] %vm668_vm2, %v390_v40  ;;  %709 = vst.msk [vmem:[%s2418_s3 + $0x280] sm:$0xff] %vm668_vm2, %v1733_v41  ;;  %v1272_v42 = vpop.f32.mrb[10].mxu0  ;;  %v1320_v43 = vpop.f32.mrb[10].mxu1 }
  0xed   :  { %v1756_v44 = vadd.f32 %v1272_v42, %v1637_v1  ;;  %v399_v45 = vpop.f32.mrb[11].mxu0  ;;  %v1759_v46 = vadd.f32 %v1320_v43, %v1637_v1  ;;  %v559_v47 = vpop.f32.mrb[11].mxu1 }
  0xee   :  { %v1762_v48 = vadd.f32 %v1637_v1, %v399_v45  ;;  %v1765_v49 = vadd.f32 %v1637_v1, %v559_v47 }
  0xef   :  { %871 = vrot.lane.b32.xlu1 %v535_v22, %s1354_s6  ;;  %869 = vrot.lane.b32.xlu0 %v530_v25, %s1354_s6  ;;  %680 = vst.msk [vmem:[%s2418_s3 + $0xa8] sm:$0xff] %vm668_vm2, %v1756_v44  ;;  %712 = vst.msk [vmem:[%s2418_s3 + $0x2a8] sm:$0xff] %vm668_vm2, %v1759_v46 }
  0xf0   :  { %679 = vst.msk [vmem:[%s2418_s3 + $0xa0] sm:$0xff] %vm668_vm2, %v1762_v48  ;;  %711 = vst.msk [vmem:[%s2418_s3 + $0x2a0] sm:$0xff] %vm668_vm2, %v1765_v49  ;;  %v1275_v50 = vpop.f32.mrb[12].mxu0  ;;  %v1323_v51 = vpop.f32.mrb[12].mxu1 }
  0xf1   :  { %v1790_v52 = vadd.f32 %v1275_v50, %v1637_v1  ;;  %v409_v53 = vpop.f32.mrb[13].mxu0  ;;  %v1793_v54 = vadd.f32 %v1323_v51, %v1637_v1  ;;  %v569_v55 = vpop.f32.mrb[13].mxu1 }
  0xf2   :  { %v1796_v56 = vadd.f32 %v1637_v1, %v409_v53  ;;  %v1799_v57 = vadd.f32 %v1637_v1, %v569_v55 }
  0xf3   :  { %811 = vrot.lane.b32.xlu1 %v385_v28, %s1354_s6  ;;  %809 = vrot.lane.b32.xlu0 %v380_v32, %s1354_s6  ;;  %682 = vst.msk [vmem:[%s2418_s3 + $0xc8] sm:$0xff] %vm668_vm2, %v1790_v52  ;;  %714 = vst.msk [vmem:[%s2418_s3 + $0x2c8] sm:$0xff] %vm668_vm2, %v1793_v54 }
  0xf4   :  { %681 = vst.msk [vmem:[%s2418_s3 + $0xc0] sm:$0xff] %vm668_vm2, %v1796_v56  ;;  %713 = vst.msk [vmem:[%s2418_s3 + $0x2c0] sm:$0xff] %vm668_vm2, %v1799_v57  ;;  %v1278_v58 = vpop.f32.mrb[14].mxu0  ;;  %v1326_v59 = vpop.f32.mrb[14].mxu1 }
  0xf5   :  { %v1824_v60 = vadd.f32 %v1278_v58, %v1637_v1  ;;  %v419_v61 = vpop.f32.mrb[15].mxu0  ;;  %v1827_v62 = vadd.f32 %v1326_v59, %v1637_v1  ;;  %v579_v63 = vpop.f32.mrb[15].mxu1 }
  0xf6   :  { %v1830_v0 = vadd.f32 %v1637_v1, %v419_v61  ;;  %v1833_v2 = vadd.f32 %v1637_v1, %v579_v63 }
  0xf7   :  { %875 = vrot.lane.b32.xlu1 %v545_v30, %s1354_s6  ;;  %873 = vrot.lane.b32.xlu0 %v540_v33, %s1354_s6  ;;  %684 = vst.msk [vmem:[%s2418_s3 + $0xe8] sm:$0xff] %vm668_vm2, %v1824_v60  ;;  %716 = vst.msk [vmem:[%s2418_s3 + $0x2e8] sm:$0xff] %vm668_vm2, %v1827_v62 }
  0xf8   :  { %683 = vst.msk [vmem:[%s2418_s3 + $0xe0] sm:$0xff] %vm668_vm2, %v1830_v0  ;;  %715 = vst.msk [vmem:[%s2418_s3 + $0x2e0] sm:$0xff] %vm668_vm2, %v1833_v2  ;;  %v1281_v3 = vpop.f32.mrb[16].mxu0  ;;  %v1329_v4 = vpop.f32.mrb[16].mxu1 }
  0xf9   :  { %v1858_v5 = vadd.f32 %v1281_v3, %v1637_v1  ;;  %v429_v6 = vpop.f32.mrb[17].mxu0  ;;  %v1861_v7 = vadd.f32 %v1329_v4, %v1637_v1  ;;  %v589_v8 = vpop.f32.mrb[17].mxu1 }
  0xfa   :  { %v1864_v9 = vadd.f32 %v1637_v1, %v429_v6  ;;  %v1867_v10 = vadd.f32 %v1637_v1, %v589_v8 }
  0xfb   :  { %815 = vrot.lane.b32.xlu1 %v395_v36, %s1354_s6  ;;  %813 = vrot.lane.b32.xlu0 %v390_v40, %s1354_s6  ;;  %686 = vst.msk [vmem:[%s2418_s3 + $0x108] sm:$0xff] %vm668_vm2, %v1858_v5  ;;  %718 = vst.msk [vmem:[%s2418_s3 + $0x308] sm:$0xff] %vm668_vm2, %v1861_v7 }
  0xfc   :  { %685 = vst.msk [vmem:[%s2418_s3 + $0x100] sm:$0xff] %vm668_vm2, %v1864_v9  ;;  %717 = vst.msk [vmem:[%s2418_s3 + $0x300] sm:$0xff] %vm668_vm2, %v1867_v10  ;;  %v1284_v11 = vpop.f32.mrb[18].mxu0  ;;  %v1332_v12 = vpop.f32.mrb[18].mxu1 }
  0xfd   :  { %v1892_v13 = vadd.f32 %v1284_v11, %v1637_v1  ;;  %v439_v14 = vpop.f32.mrb[19].mxu0  ;;  %v1895_v15 = vadd.f32 %v1332_v12, %v1637_v1  ;;  %v599_v16 = vpop.f32.mrb[19].mxu1 }
  0xfe   :  { %v1898_v17 = vadd.f32 %v1637_v1, %v439_v14  ;;  %v1901_v18 = vadd.f32 %v1637_v1, %v599_v16 }
  0xff   :  { %879 = vrot.lane.b32.xlu1 %v1729_v38, %s1354_s6  ;;  %877 = vrot.lane.b32.xlu0 %v1733_v41, %s1354_s6  ;;  %688 = vst.msk [vmem:[%s2418_s3 + $0x128] sm:$0xff] %vm668_vm2, %v1892_v13  ;;  %720 = vst.msk [vmem:[%s2418_s3 + $0x328] sm:$0xff] %vm668_vm2, %v1895_v15 }
 0x100   :  { %687 = vst.msk [vmem:[%s2418_s3 + $0x120] sm:$0xff] %vm668_vm2, %v1898_v17  ;;  %719 = vst.msk [vmem:[%s2418_s3 + $0x320] sm:$0xff] %vm668_vm2, %v1901_v18  ;;  %v1287_v19 = vpop.f32.mrb[20].mxu0  ;;  %v1335_v20 = vpop.f32.mrb[20].mxu1 }
 0x101   :  { %v1928_v21 = vadd.f32 %v1287_v19, %v1637_v1  ;;  %v449_v22 = vpop.f32.mrb[21].mxu0  ;;  %v1931_v23 = vadd.f32 %v1335_v20, %v1637_v1  ;;  %v609_v24 = vpop.f32.mrb[21].mxu1 }
 0x102   :  { %v1934_v25 = vadd.f32 %v1637_v1, %v449_v22  ;;  %v1937_v26 = vadd.f32 %v1637_v1, %v609_v24 }
 0x103   :  { %819 = vrot.lane.b32.xlu1 %v1756_v44, %s1354_s6  ;;  %817 = vrot.lane.b32.xlu0 %v1762_v48, %s1354_s6  ;;  %690 = vst.msk [vmem:[%s2418_s3 + $0x148] sm:$0xff] %vm668_vm2, %v1928_v21  ;;  %722 = vst.msk [vmem:[%s2418_s3 + $0x348] sm:$0xff] %vm668_vm2, %v1931_v23 }
 0x104   :  { %689 = vst.msk [vmem:[%s2418_s3 + $0x140] sm:$0xff] %vm668_vm2, %v1934_v25  ;;  %721 = vst.msk [vmem:[%s2418_s3 + $0x340] sm:$0xff] %vm668_vm2, %v1937_v26  ;;  %v1290_v27 = vpop.f32.mrb[22].mxu0  ;;  %v1338_v28 = vpop.f32.mrb[22].mxu1 }
 0x105   :  { %v1964_v29 = vadd.f32 %v1290_v27, %v1637_v1  ;;  %v459_v30 = vpop.f32.mrb[23].mxu0  ;;  %v1967_v31 = vadd.f32 %v1338_v28, %v1637_v1  ;;  %v619_v32 = vpop.f32.mrb[23].mxu1 }
 0x106   :  { %v1970_v33 = vadd.f32 %v1637_v1, %v459_v30  ;;  %v1973_v34 = vadd.f32 %v1637_v1, %v619_v32 }
 0x107   :  { %883 = vrot.lane.b32.xlu1 %v1759_v46, %s1354_s6  ;;  %881 = vrot.lane.b32.xlu0 %v1765_v49, %s1354_s6  ;;  %692 = vst.msk [vmem:[%s2418_s3 + $0x168] sm:$0xff] %vm668_vm2, %v1964_v29  ;;  %724 = vst.msk [vmem:[%s2418_s3 + $0x368] sm:$0xff] %vm668_vm2, %v1967_v31 }
 0x108   :  { %691 = vst.msk [vmem:[%s2418_s3 + $0x160] sm:$0xff] %vm668_vm2, %v1970_v33  ;;  %723 = vst.msk [vmem:[%s2418_s3 + $0x360] sm:$0xff] %vm668_vm2, %v1973_v34  ;;  %v1293_v35 = vpop.f32.mrb[24].mxu0  ;;  %v1341_v36 = vpop.f32.mrb[24].mxu1 }
 0x109   :  { %v2000_v37 = vadd.f32 %v1293_v35, %v1637_v1  ;;  %v469_v38 = vpop.f32.mrb[25].mxu0  ;;  %v2003_v39 = vadd.f32 %v1341_v36, %v1637_v1  ;;  %v629_v40 = vpop.f32.mrb[25].mxu1 }
 0x10a   :  { %v2006_v41 = vadd.f32 %v1637_v1, %v469_v38  ;;  %v2009_v42 = vadd.f32 %v1637_v1, %v629_v40 }
 0x10b   :  { %823 = vrot.lane.b32.xlu1 %v1790_v52, %s1354_s6  ;;  %821 = vrot.lane.b32.xlu0 %v1796_v56, %s1354_s6  ;;  %694 = vst.msk [vmem:[%s2418_s3 + $0x188] sm:$0xff] %vm668_vm2, %v2000_v37  ;;  %726 = vst.msk [vmem:[%s2418_s3 + $0x388] sm:$0xff] %vm668_vm2, %v2003_v39 }
 0x10c   :  { %693 = vst.msk [vmem:[%s2418_s3 + $0x180] sm:$0xff] %vm668_vm2, %v2006_v41  ;;  %725 = vst.msk [vmem:[%s2418_s3 + $0x380] sm:$0xff] %vm668_vm2, %v2009_v42  ;;  %v1296_v43 = vpop.f32.mrb[26].mxu0  ;;  %v1344_v44 = vpop.f32.mrb[26].mxu1 }
 0x10d   :  { %v485_v45 = vadd.f32 %v1296_v43, %v1637_v1  ;;  %v479_v46 = vpop.f32.mrb[27].mxu0  ;;  %v645_v47 = vadd.f32 %v1344_v44, %v1637_v1  ;;  %v639_v48 = vpop.f32.mrb[27].mxu1 }
 0x10e   :  { %v480_v49 = vadd.f32 %v1637_v1, %v479_v46  ;;  %v640_v50 = vadd.f32 %v1637_v1, %v639_v48 }
 0x10f   :  { %887 = vrot.lane.b32.xlu1 %v1793_v54, %s1354_s6  ;;  %885 = vrot.lane.b32.xlu0 %v1799_v57, %s1354_s6  ;;  %696 = vst.msk [vmem:[%s2418_s3 + $0x1a8] sm:$0xff] %vm668_vm2, %v485_v45  ;;  %728 = vst.msk [vmem:[%s2418_s3 + $0x3a8] sm:$0xff] %vm668_vm2, %v645_v47 }
 0x110   :  { %695 = vst.msk [vmem:[%s2418_s3 + $0x1a0] sm:$0xff] %vm668_vm2, %v480_v49  ;;  %727 = vst.msk [vmem:[%s2418_s3 + $0x3a0] sm:$0xff] %vm668_vm2, %v640_v50  ;;  %v1299_v51 = vpop.f32.mrb[28].mxu0  ;;  %v1347_v52 = vpop.f32.mrb[28].mxu1 }
 0x111   :  { %v495_v53 = vadd.f32 %v1299_v51, %v1637_v1  ;;  %v489_v54 = vpop.f32.mrb[29].mxu0  ;;  %v655_v55 = vadd.f32 %v1347_v52, %v1637_v1  ;;  %v649_v56 = vpop.f32.mrb[29].mxu1 }
 0x112   :  { %v490_v57 = vadd.f32 %v1637_v1, %v489_v54  ;;  %v650_v58 = vadd.f32 %v1637_v1, %v649_v56 }
 0x113   :  { %827 = vrot.lane.b32.xlu1 %v1824_v60, %s1354_s6  ;;  %825 = vrot.lane.b32.xlu0 %v1830_v0, %s1354_s6  ;;  %698 = vst.msk [vmem:[%s2418_s3 + $0x1c8] sm:$0xff] %vm668_vm2, %v495_v53  ;;  %730 = vst.msk [vmem:[%s2418_s3 + $0x3c8] sm:$0xff] %vm668_vm2, %v655_v55 }
 0x114   :  { %697 = vst.msk [vmem:[%s2418_s3 + $0x1c0] sm:$0xff] %vm668_vm2, %v490_v57  ;;  %729 = vst.msk [vmem:[%s2418_s3 + $0x3c0] sm:$0xff] %vm668_vm2, %v650_v58  ;;  %v1302_v59 = vpop.f32.mrb[30].mxu0  ;;  %v1350_v60 = vpop.f32.mrb[30].mxu1 }
 0x115   :  { %v505_v61 = vadd.f32 %v1302_v59, %v1637_v1  ;;  %v499_v63 = vpop.f32.mrb[31].mxu0  ;;  %v665_v0 = vadd.f32 %v1350_v60, %v1637_v1  ;;  %v659_v3 = vpop.f32.mrb[31].mxu1 }
 0x116   :  { %v500_v4 = vadd.f32 %v1637_v1, %v499_v63  ;;  %v660_v6 = vadd.f32 %v1637_v1, %v659_v3 }
 0x117   :  { %891 = vrot.lane.b32.xlu1 %v1827_v62, %s1354_s6  ;;  %889 = vrot.lane.b32.xlu0 %v1833_v2, %s1354_s6  ;;  %700 = vst.msk [vmem:[%s2418_s3 + $0x1e8] sm:$0xff] %vm668_vm2, %v505_v61  ;;  %732 = vst.msk [vmem:[%s2418_s3 + $0x3e8] sm:$0xff] %vm668_vm2, %v665_v0 }
 0x118   :  { %699 = vst.msk [vmem:[%s2418_s3 + $0x1e0] sm:$0xff] %vm668_vm2, %v500_v4  ;;  %731 = vst.msk [vmem:[%s2418_s3 + $0x3e0] sm:$0xff] %vm668_vm2, %v660_v6 }
 0x11b   :  { %831 = vrot.lane.b32.xlu1 %v1858_v5, %s1354_s6  ;;  %829 = vrot.lane.b32.xlu0 %v1864_v9, %s1354_s6 }
 0x11f   :  { %895 = vrot.lane.b32.xlu1 %v1861_v7, %s1354_s6  ;;  %893 = vrot.lane.b32.xlu0 %v1867_v10, %s1354_s6 }
 0x123   :  { %835 = vrot.lane.b32.xlu1 %v1892_v13, %s1354_s6  ;;  %833 = vrot.lane.b32.xlu0 %v1898_v17, %s1354_s6 }
 0x127   :  { %899 = vrot.lane.b32.xlu1 %v1895_v15, %s1354_s6  ;;  %897 = vrot.lane.b32.xlu0 %v1901_v18, %s1354_s6 }
 0x12b   :  { %839 = vrot.lane.b32.xlu1 %v1928_v21, %s1354_s6  ;;  %837 = vrot.lane.b32.xlu0 %v1934_v25, %s1354_s6 }
 0x12f   :  { %903 = vrot.lane.b32.xlu1 %v1931_v23, %s1354_s6  ;;  %901 = vrot.lane.b32.xlu0 %v1937_v26, %s1354_s6 }
 0x133   :  { %843 = vrot.lane.b32.xlu1 %v1964_v29, %s1354_s6  ;;  %841 = vrot.lane.b32.xlu0 %v1970_v33, %s1354_s6 }
 0x137   :  { %907 = vrot.lane.b32.xlu1 %v1967_v31, %s1354_s6  ;;  %905 = vrot.lane.b32.xlu0 %v1973_v34, %s1354_s6 }
 0x13b   :  { %847 = vrot.lane.b32.xlu1 %v2000_v37, %s1354_s6  ;;  %845 = vrot.lane.b32.xlu0 %v2006_v41, %s1354_s6 }
 0x13f   :  { %911 = vrot.lane.b32.xlu1 %v2003_v39, %s1354_s6  ;;  %909 = vrot.lane.b32.xlu0 %v2009_v42, %s1354_s6 }
 0x143   :  { %851 = vrot.lane.b32.xlu1 %v485_v45, %s1354_s6  ;;  %849 = vrot.lane.b32.xlu0 %v480_v49, %s1354_s6 }
 0x147   :  { %915 = vrot.lane.b32.xlu1 %v645_v47, %s1354_s6  ;;  %913 = vrot.lane.b32.xlu0 %v640_v50, %s1354_s6 }
 0x14b   :  { %855 = vrot.lane.b32.xlu1 %v495_v53, %s1354_s6  ;;  %853 = vrot.lane.b32.xlu0 %v490_v57, %s1354_s6 }
 0x14d   :  { %v864_v1 = vpop.permute.xlu1 %863  ;;  %v800_v62 = vpop.permute.xlu0 %799 }
 0x14e   :  { %1157 = vst.msk [vmem:[%s2418_s3 + $0x218] sm:$0xff] %vm668_vm2, %v864_v1  ;;  %1125 = vst.msk [vmem:[%s2418_s3 + $0x18] sm:$0xff] %vm668_vm2, %v800_v62 }
 0x14f   :  { %919 = vrot.lane.b32.xlu1 %v655_v55, %s1354_s6  ;;  %917 = vrot.lane.b32.xlu0 %v650_v58, %s1354_s6 }
 0x151   :  { %v804_v2 = vpop.permute.xlu1 %803  ;;  %v798_v5 = vpop.permute.xlu0 %797 }
 0x152   :  { %1127 = vst.msk [vmem:[%s2418_s3 + $0x38] sm:$0xff] %vm668_vm2, %v804_v2  ;;  %1124 = vst.msk [vmem:[%s2418_s3 + $0x10] sm:$0xff] %vm668_vm2, %v798_v5 }
 0x153   :  { %859 = vrot.lane.b32.xlu1 %v505_v61, %s1354_s6  ;;  %857 = vrot.lane.b32.xlu0 %v500_v4, %s1354_s6 }
 0x155   :  { %v868_v7 = vpop.permute.xlu1 %867  ;;  %v862_v8 = vpop.permute.xlu0 %861 }
 0x156   :  { %1159 = vst.msk [vmem:[%s2418_s3 + $0x238] sm:$0xff] %vm668_vm2, %v868_v7  ;;  %1156 = vst.msk [vmem:[%s2418_s3 + $0x210] sm:$0xff] %vm668_vm2, %v862_v8 }
 0x157   :  { %923 = vrot.lane.b32.xlu1 %v665_v0, %s1354_s6  ;;  %921 = vrot.lane.b32.xlu0 %v660_v6, %s1354_s6 }
 0x159   :  { %v802_v9 = vpop.permute.xlu1 %801  ;;  %v866_v10 = vpop.permute.xlu0 %865 }
 0x15a   :  { %1126 = vst.msk [vmem:[%s2418_s3 + $0x30] sm:$0xff] %vm668_vm2, %v802_v9  ;;  %1158 = vst.msk [vmem:[%s2418_s3 + $0x230] sm:$0xff] %vm668_vm2, %v866_v10 }
 0x15d   :  { %v808_v11 = vpop.permute.xlu1 %807  ;;  %v806_v12 = vpop.permute.xlu0 %805 }
 0x15e   :  { %1129 = vst.msk [vmem:[%s2418_s3 + $0x58] sm:$0xff] %vm668_vm2, %v808_v11  ;;  %1128 = vst.msk [vmem:[%s2418_s3 + $0x50] sm:$0xff] %vm668_vm2, %v806_v12 }
 0x161   :  { %v872_v13 = vpop.permute.xlu1 %871  ;;  %v870_v14 = vpop.permute.xlu0 %869 }
 0x162   :  { %1161 = vst.msk [vmem:[%s2418_s3 + $0x258] sm:$0xff] %vm668_vm2, %v872_v13  ;;  %1160 = vst.msk [vmem:[%s2418_s3 + $0x250] sm:$0xff] %vm668_vm2, %v870_v14 }
 0x165   :  { %v812_v15 = vpop.permute.xlu1 %811  ;;  %v810_v16 = vpop.permute.xlu0 %809 }
 0x166   :  { %1131 = vst.msk [vmem:[%s2418_s3 + $0x78] sm:$0xff] %vm668_vm2, %v812_v15  ;;  %1130 = vst.msk [vmem:[%s2418_s3 + $0x70] sm:$0xff] %vm668_vm2, %v810_v16 }
 0x169   :  { %v876_v17 = vpop.permute.xlu1 %875  ;;  %v874_v18 = vpop.permute.xlu0 %873 }
 0x16a   :  { %1163 = vst.msk [vmem:[%s2418_s3 + $0x278] sm:$0xff] %vm668_vm2, %v876_v17  ;;  %1162 = vst.msk [vmem:[%s2418_s3 + $0x270] sm:$0xff] %vm668_vm2, %v874_v18 }
 0x16d   :  { %v816_v19 = vpop.permute.xlu1 %815  ;;  %v814_v20 = vpop.permute.xlu0 %813 }
 0x16e   :  { %1133 = vst.msk [vmem:[%s2418_s3 + $0x98] sm:$0xff] %vm668_vm2, %v816_v19  ;;  %1132 = vst.msk [vmem:[%s2418_s3 + $0x90] sm:$0xff] %vm668_vm2, %v814_v20 }
 0x171   :  { %v880_v21 = vpop.permute.xlu1 %879  ;;  %v878_v22 = vpop.permute.xlu0 %877 }
 0x172   :  { %1165 = vst.msk [vmem:[%s2418_s3 + $0x298] sm:$0xff] %vm668_vm2, %v880_v21  ;;  %1164 = vst.msk [vmem:[%s2418_s3 + $0x290] sm:$0xff] %vm668_vm2, %v878_v22 }
 0x175   :  { %v820_v23 = vpop.permute.xlu1 %819  ;;  %v818_v24 = vpop.permute.xlu0 %817 }
 0x176   :  { %1135 = vst.msk [vmem:[%s2418_s3 + $0xb8] sm:$0xff] %vm668_vm2, %v820_v23  ;;  %1134 = vst.msk [vmem:[%s2418_s3 + $0xb0] sm:$0xff] %vm668_vm2, %v818_v24 }
 0x179   :  { %v884_v25 = vpop.permute.xlu1 %883  ;;  %v882_v26 = vpop.permute.xlu0 %881 }
 0x17a   :  { %1167 = vst.msk [vmem:[%s2418_s3 + $0x2b8] sm:$0xff] %vm668_vm2, %v884_v25  ;;  %1166 = vst.msk [vmem:[%s2418_s3 + $0x2b0] sm:$0xff] %vm668_vm2, %v882_v26 }
 0x17d   :  { %v824_v27 = vpop.permute.xlu1 %823  ;;  %v822_v28 = vpop.permute.xlu0 %821 }
 0x17e   :  { %1137 = vst.msk [vmem:[%s2418_s3 + $0xd8] sm:$0xff] %vm668_vm2, %v824_v27  ;;  %1136 = vst.msk [vmem:[%s2418_s3 + $0xd0] sm:$0xff] %vm668_vm2, %v822_v28 }
 0x181   :  { %v888_v29 = vpop.permute.xlu1 %887  ;;  %v886_v30 = vpop.permute.xlu0 %885 }
 0x182   :  { %1169 = vst.msk [vmem:[%s2418_s3 + $0x2d8] sm:$0xff] %vm668_vm2, %v888_v29  ;;  %1168 = vst.msk [vmem:[%s2418_s3 + $0x2d0] sm:$0xff] %vm668_vm2, %v886_v30 }
 0x185   :  { %v828_v31 = vpop.permute.xlu1 %827  ;;  %v826_v32 = vpop.permute.xlu0 %825 }
 0x186   :  { %1139 = vst.msk [vmem:[%s2418_s3 + $0xf8] sm:$0xff] %vm668_vm2, %v828_v31  ;;  %1138 = vst.msk [vmem:[%s2418_s3 + $0xf0] sm:$0xff] %vm668_vm2, %v826_v32 }
 0x189   :  { %v892_v33 = vpop.permute.xlu1 %891  ;;  %v890_v34 = vpop.permute.xlu0 %889 }
 0x18a   :  { %1171 = vst.msk [vmem:[%s2418_s3 + $0x2f8] sm:$0xff] %vm668_vm2, %v892_v33  ;;  %1170 = vst.msk [vmem:[%s2418_s3 + $0x2f0] sm:$0xff] %vm668_vm2, %v890_v34 }
 0x18d   :  { %v832_v35 = vpop.permute.xlu1 %831  ;;  %v830_v36 = vpop.permute.xlu0 %829 }
 0x18e   :  { %1141 = vst.msk [vmem:[%s2418_s3 + $0x118] sm:$0xff] %vm668_vm2, %v832_v35  ;;  %1140 = vst.msk [vmem:[%s2418_s3 + $0x110] sm:$0xff] %vm668_vm2, %v830_v36 }
 0x191   :  { %v896_v37 = vpop.permute.xlu1 %895  ;;  %v894_v38 = vpop.permute.xlu0 %893 }
 0x192   :  { %1173 = vst.msk [vmem:[%s2418_s3 + $0x318] sm:$0xff] %vm668_vm2, %v896_v37  ;;  %1172 = vst.msk [vmem:[%s2418_s3 + $0x310] sm:$0xff] %vm668_vm2, %v894_v38 }
 0x195   :  { %v836_v39 = vpop.permute.xlu1 %835  ;;  %v834_v40 = vpop.permute.xlu0 %833 }
 0x196   :  { %1143 = vst.msk [vmem:[%s2418_s3 + $0x138] sm:$0xff] %vm668_vm2, %v836_v39  ;;  %1142 = vst.msk [vmem:[%s2418_s3 + $0x130] sm:$0xff] %vm668_vm2, %v834_v40 }
 0x199   :  { %v900_v41 = vpop.permute.xlu1 %899  ;;  %v898_v42 = vpop.permute.xlu0 %897 }
 0x19a   :  { %1175 = vst.msk [vmem:[%s2418_s3 + $0x338] sm:$0xff] %vm668_vm2, %v900_v41  ;;  %1174 = vst.msk [vmem:[%s2418_s3 + $0x330] sm:$0xff] %vm668_vm2, %v898_v42 }
 0x19d   :  { %v840_v43 = vpop.permute.xlu1 %839  ;;  %v838_v44 = vpop.permute.xlu0 %837 }
 0x19e   :  { %1145 = vst.msk [vmem:[%s2418_s3 + $0x158] sm:$0xff] %vm668_vm2, %v840_v43  ;;  %1144 = vst.msk [vmem:[%s2418_s3 + $0x150] sm:$0xff] %vm668_vm2, %v838_v44 }
 0x1a1   :  { %v904_v45 = vpop.permute.xlu1 %903  ;;  %v902_v46 = vpop.permute.xlu0 %901 }
 0x1a2   :  { %1177 = vst.msk [vmem:[%s2418_s3 + $0x358] sm:$0xff] %vm668_vm2, %v904_v45  ;;  %1176 = vst.msk [vmem:[%s2418_s3 + $0x350] sm:$0xff] %vm668_vm2, %v902_v46 }
 0x1a5   :  { %v844_v47 = vpop.permute.xlu1 %843  ;;  %v842_v48 = vpop.permute.xlu0 %841 }
 0x1a6   :  { %1147 = vst.msk [vmem:[%s2418_s3 + $0x178] sm:$0xff] %vm668_vm2, %v844_v47  ;;  %1146 = vst.msk [vmem:[%s2418_s3 + $0x170] sm:$0xff] %vm668_vm2, %v842_v48 }
 0x1a9   :  { %v908_v49 = vpop.permute.xlu1 %907  ;;  %v906_v50 = vpop.permute.xlu0 %905 }
 0x1aa   :  { %1179 = vst.msk [vmem:[%s2418_s3 + $0x378] sm:$0xff] %vm668_vm2, %v908_v49  ;;  %1178 = vst.msk [vmem:[%s2418_s3 + $0x370] sm:$0xff] %vm668_vm2, %v906_v50 }
 0x1ad   :  { %v848_v51 = vpop.permute.xlu1 %847  ;;  %v846_v52 = vpop.permute.xlu0 %845 }
 0x1ae   :  { %1149 = vst.msk [vmem:[%s2418_s3 + $0x198] sm:$0xff] %vm668_vm2, %v848_v51  ;;  %1148 = vst.msk [vmem:[%s2418_s3 + $0x190] sm:$0xff] %vm668_vm2, %v846_v52 }
 0x1b1   :  { %v912_v53 = vpop.permute.xlu1 %911  ;;  %v910_v54 = vpop.permute.xlu0 %909 }
 0x1b2   :  { %1181 = vst.msk [vmem:[%s2418_s3 + $0x398] sm:$0xff] %vm668_vm2, %v912_v53  ;;  %1180 = vst.msk [vmem:[%s2418_s3 + $0x390] sm:$0xff] %vm668_vm2, %v910_v54 }
 0x1b5   :  { %v852_v55 = vpop.permute.xlu1 %851  ;;  %v850_v56 = vpop.permute.xlu0 %849 }
 0x1b6   :  { %1151 = vst.msk [vmem:[%s2418_s3 + $0x1b8] sm:$0xff] %vm668_vm2, %v852_v55  ;;  %1150 = vst.msk [vmem:[%s2418_s3 + $0x1b0] sm:$0xff] %vm668_vm2, %v850_v56 }
 0x1b9   :  { %v916_v57 = vpop.permute.xlu1 %915  ;;  %v914_v58 = vpop.permute.xlu0 %913 }
 0x1ba   :  { %1183 = vst.msk [vmem:[%s2418_s3 + $0x3b8] sm:$0xff] %vm668_vm2, %v916_v57  ;;  %1182 = vst.msk [vmem:[%s2418_s3 + $0x3b0] sm:$0xff] %vm668_vm2, %v914_v58 }
 0x1bd   :  { %v856_v59 = vpop.permute.xlu1 %855  ;;  %v854_v60 = vpop.permute.xlu0 %853 }
 0x1be   :  { %1153 = vst.msk [vmem:[%s2418_s3 + $0x1d8] sm:$0xff] %vm668_vm2, %v856_v59  ;;  %1152 = vst.msk [vmem:[%s2418_s3 + $0x1d0] sm:$0xff] %vm668_vm2, %v854_v60 }
 0x1c1   :  { %v920_v61 = vpop.permute.xlu1 %919  ;;  %v918_v63 = vpop.permute.xlu0 %917 }
 0x1c2   :  { %1185 = vst.msk [vmem:[%s2418_s3 + $0x3d8] sm:$0xff] %vm668_vm2, %v920_v61  ;;  %1184 = vst.msk [vmem:[%s2418_s3 + $0x3d0] sm:$0xff] %vm668_vm2, %v918_v63 }
 0x1c5   :  { %v860_v0 = vpop.permute.xlu1 %859  ;;  %v858_v3 = vpop.permute.xlu0 %857 }
 0x1c6   :  { %1155 = vst.msk [vmem:[%s2418_s3 + $0x1f8] sm:$0xff] %vm668_vm2, %v860_v0  ;;  %1154 = vst.msk [vmem:[%s2418_s3 + $0x1f0] sm:$0xff] %vm668_vm2, %v858_v3 }
 0x1c9   :  { %v924_v4 = vpop.permute.xlu1 %923  ;;  %v922_v6 = vpop.permute.xlu0 %921 }
 0x1ca   :  { %1187 = vst.msk [vmem:[%s2418_s3 + $0x3f8] sm:$0xff] %vm668_vm2, %v924_v4  ;;  %1186 = vst.msk [vmem:[%s2418_s3 + $0x3f0] sm:$0xff] %vm668_vm2, %v922_v6 }

</bundles_post_ra>
